<compile_context>
chip_gen: v7x
topology: tpu7x:2x2x1
jax: 0.10.0
libtpu: 0.0.40
codegen_flags: <defaults>
</compile_context>

<pallas_src>
import jax
import jax.numpy as jnp
from jax.experimental import pallas as pl
from jax.experimental.pallas import tpu as pltpu


_LN_EPS = 1e-5    # nn.LayerNorm default eps
_L2_EPS = 1e-12   # F.normalize default eps


def _norm_softmax_kernel(x_ref, w_ref, temp_ref, out_ref):
    """Fused NormSoftmax forward, whole (padded) batch in one invocation.

    x_ref   : (Bp, F)  f32, VMEM
    w_ref   : (F, Cp)  f32, VMEM  (classes zero-padded to a lane multiple)
    temp_ref: (1,)     f32, SMEM
    out_ref : (Bp, Cp) f32, VMEM
    """
    x = x_ref[...]

    # LayerNorm(in_features, elementwise_affine=False): biased var, eps=1e-5.
    mu = jnp.mean(x, axis=-1, keepdims=True)
    xc = x - mu
    var = jnp.mean(xc * xc, axis=-1, keepdims=True)
    xn = xc * jax.lax.rsqrt(var + _LN_EPS)

    # F.normalize(x, p=2, dim=1, eps=1e-12): L2-normalize rows over features.
    xn = xn / jnp.maximum(
        jnp.sqrt(jnp.sum(xn * xn, axis=-1, keepdims=True)), _L2_EPS)

    # F.normalize(weight, p=2, dim=1): weight is stored (in_features, out_features),
    # so dim=1 is the class axis.  Zero-padded class columns leave row norms
    # unchanged, so normalizing the padded slab is exact for the real columns.
    w = w_ref[...]
    wn = w / jnp.maximum(
        jnp.sqrt(jnp.sum(w * w, axis=-1, keepdims=True)), _L2_EPS)

    logits = jnp.dot(xn, wn, preferred_element_type=jnp.float32)

    # x / temperature  ->  one scalar reciprocal + a broadcast multiply.
    inv_t = 1.0 / temp_ref[0]
    out_ref[...] = logits * inv_t


def norm_softmax_forward(x, weight, temperature):
    """NormSoftmax forward.

    x           : (B, in_features) float32
    weight      : (in_features, out_features) float32   (module's storage layout)
    temperature : python float or scalar array
    returns     : (B, out_features) float32
    """
    B, F = x.shape
    F_w, C = weight.shape
    assert F == F_w, "weight must be (in_features, out_features)"

    # Pad batch to a sublane multiple and classes to a lane multiple so the
    # whole forward is one un-tiled, lane-dense kernel invocation.
    Bp = 8 * pl.cdiv(B, 8)
    Cp = 128 * pl.cdiv(C, 128)
    x_p = jnp.pad(x, ((0, Bp - B), (0, 0)))
    w_p = jnp.pad(weight, ((0, 0), (0, Cp - C)))
    temp = jnp.asarray(temperature, jnp.float32).reshape((1,))

    out = pl.pallas_call(
        _norm_softmax_kernel,
        out_shape=jax.ShapeDtypeStruct((Bp, Cp), jnp.float32),
        in_specs=[
            pl.BlockSpec(memory_space=pltpu.MemorySpace.VMEM),   # x   (whole)
            pl.BlockSpec(memory_space=pltpu.MemorySpace.VMEM),   # w   (whole)
            pl.BlockSpec(memory_space=pltpu.MemorySpace.SMEM),   # temperature
        ],
        out_specs=pl.BlockSpec(memory_space=pltpu.MemorySpace.VMEM),
    )(x_p, w_p, temp)

    return out[:B, :C]


def _reference(x, weight, temperature):
    """Pure-JAX reference matching the PyTorch forward."""
    mu = jnp.mean(x, axis=-1, keepdims=True)
    var = jnp.mean((x - mu) ** 2, axis=-1, keepdims=True)
    xn = (x - mu) * jax.lax.rsqrt(var + _LN_EPS)
    xn = xn / jnp.maximum(jnp.linalg.norm(xn, axis=-1, keepdims=True), _L2_EPS)
    wn = weight / jnp.maximum(
        jnp.linalg.norm(weight, axis=-1, keepdims=True), _L2_EPS)
    return (xn @ wn) / temperature


if __name__ == "__main__":
    key = jax.random.PRNGKey(0)
    kx, kw = jax.random.split(key)

    # Small shapes implied by the module: x is (batch, in_features).
    B, in_features, out_features = 8, 128, 9
    temperature = 0.05

    x = jax.random.normal(kx, (B, in_features), jnp.float32)
    # xavier_uniform_ over (in_features, out_features), as in the module init.
    limit = (6.0 / (in_features + out_features)) ** 0.5
    weight = jax.random.uniform(kw, (in_features, out_features), jnp.float32,
                                -limit, limit)

    out = norm_softmax_forward(x, weight, temperature)
    jax.block_until_ready(out)

    assert out.shape == (B, out_features)

    ref = _reference(x, weight, jnp.float32(temperature))
    max_err = float(jnp.max(jnp.abs(out - ref)))
    assert jnp.allclose(out, ref, atol=1e-3, rtol=1e-3), max_err

    print("KERNEL_OK")
</pallas_src>

<mosaic_0001>
module attributes {stable_mosaic.version = 11 : i64} {
  func.func @_norm_softmax_kernel(%arg0: memref<8x128xf32, #tpu.memory_space<vmem>>, %arg1: memref<128x128xf32, #tpu.memory_space<vmem>>, %arg2: memref<1xf32, #tpu.memory_space<smem>>, %arg3: memref<8x128xf32, #tpu.memory_space<vmem>>) attributes {dimension_semantics = [], scalar_prefetch = 0 : i64, scratch_operands = 0 : i64, tpu.core_type = #tpu.core_type<tc>} {
    %c0 = arith.constant 0 : index
    %c0_0 = arith.constant 0 : index
    %0 = vector.load %arg0[%c0, %c0_0] : memref<8x128xf32, #tpu.memory_space<vmem>>, vector<8x128xf32>
    %cst = arith.constant dense<0.000000e+00> : vector<8xf32>
    %1 = vector.multi_reduction <add>, %0, %cst [1] : vector<8x128xf32> to vector<8xf32>
    %2 = vector.shape_cast %1 : vector<8xf32> to vector<8x1xf32>
    %cst_1 = arith.constant 1.280000e+02 : f32
    %3 = vector.broadcast %cst_1 : f32 to vector<8x1xf32>
    %4 = arith.divf %2, %3 : vector<8x1xf32>
    %5 = vector.broadcast %4 : vector<8x1xf32> to vector<8x128xf32>
    %6 = arith.subf %0, %5 : vector<8x128xf32>
    %7 = arith.mulf %6, %6 : vector<8x128xf32>
    %cst_2 = arith.constant dense<0.000000e+00> : vector<8xf32>
    %8 = vector.multi_reduction <add>, %7, %cst_2 [1] : vector<8x128xf32> to vector<8xf32>
    %9 = vector.shape_cast %8 : vector<8xf32> to vector<8x1xf32>
    %cst_3 = arith.constant 1.280000e+02 : f32
    %10 = vector.broadcast %cst_3 : f32 to vector<8x1xf32>
    %11 = arith.divf %9, %10 : vector<8x1xf32>
    %cst_4 = arith.constant 9.99999974E-6 : f32
    %12 = vector.broadcast %cst_4 : f32 to vector<8x1xf32>
    %13 = arith.addf %11, %12 : vector<8x1xf32>
    %14 = math.rsqrt %13 : vector<8x1xf32>
    %15 = vector.broadcast %14 : vector<8x1xf32> to vector<8x128xf32>
    %16 = arith.mulf %6, %15 : vector<8x128xf32>
    %17 = arith.mulf %16, %16 : vector<8x128xf32>
    %cst_5 = arith.constant dense<0.000000e+00> : vector<8xf32>
    %18 = vector.multi_reduction <add>, %17, %cst_5 [1] : vector<8x128xf32> to vector<8xf32>
    %19 = vector.shape_cast %18 : vector<8xf32> to vector<8x1xf32>
    %20 = math.sqrt %19 : vector<8x1xf32>
    %cst_6 = arith.constant 9.99999996E-13 : f32
    %21 = vector.broadcast %cst_6 : f32 to vector<8x1xf32>
    %22 = arith.maximumf %20, %21 : vector<8x1xf32>
    %23 = vector.broadcast %22 : vector<8x1xf32> to vector<8x128xf32>
    %24 = arith.divf %16, %23 : vector<8x128xf32>
    %c0_7 = arith.constant 0 : index
    %c0_8 = arith.constant 0 : index
    %25 = vector.load %arg1[%c0_7, %c0_8] : memref<128x128xf32, #tpu.memory_space<vmem>>, vector<128x128xf32>
    %26 = arith.mulf %25, %25 : vector<128x128xf32>
    %cst_9 = arith.constant dense<0.000000e+00> : vector<128xf32>
    %27 = vector.multi_reduction <add>, %26, %cst_9 [1] : vector<128x128xf32> to vector<128xf32>
    %28 = vector.shape_cast %27 : vector<128xf32> to vector<128x1xf32>
    %29 = math.sqrt %28 : vector<128x1xf32>
    %cst_10 = arith.constant 9.99999996E-13 : f32
    %30 = vector.broadcast %cst_10 : f32 to vector<128x1xf32>
    %31 = arith.maximumf %29, %30 : vector<128x1xf32>
    %32 = vector.broadcast %31 : vector<128x1xf32> to vector<128x128xf32>
    %33 = arith.divf %25, %32 : vector<128x128xf32>
    %cst_11 = arith.constant dense<0.000000e+00> : vector<8x128xf32>
    %34 = tpu.matmul %24, %33, %cst_11 {dimension_numbers = #tpu.dot_dimension_numbers<[1], [0], [0], [1], [0, 0, 1, 1], [], []>} : vector<8x128xf32>, vector<128x128xf32>, vector<8x128xf32> -> vector<8x128xf32>
    %c0_12 = arith.constant 0 : index
    %35 = memref.load %arg2[%c0_12] : memref<1xf32, #tpu.memory_space<smem>>
    %cst_13 = arith.constant 1.000000e+00 : f32
    %36 = arith.divf %cst_13, %35 : f32
    %37 = vector.broadcast %36 : f32 to vector<8x128xf32>
    %38 = arith.mulf %34, %37 : vector<8x128xf32>
    %c0_14 = arith.constant 0 : index
    %c0_15 = arith.constant 0 : index
    %39 = vector.load %arg3[%c0_14, %c0_15] : memref<8x128xf32, #tpu.memory_space<vmem>>, vector<8x128xf32>
    tpu.vector_store %arg3[%c0_14, %c0_15], %38 {strides = array<i32>} : memref<8x128xf32, #tpu.memory_space<vmem>>, vector<8x128xf32>,
    return
  }
}

</mosaic_0001>

<bundles_post_ra>
// kernel: tpu_custom_call.1
= control target key start
LH: loop header
LB: loop body
LE: loop exit
PB: predicated region body
PF: predicated region fallthrough
CT: control target
= control target key end

     0   :  { %9 = vsyncpa [#allocation4], 0  ;;  %s869_s0 = inlined_call_operand.hbm [shape: f32[8,128], index: 0, kind: input, shape index: {}]   ;;  %s870_s1 = inlined_call_operand.hbm [shape: f32[128,128], index: 1, kind: input, shape index: {}]   ;;  %s871_s2 = inlined_call_operand.<no memory space> [shape: f32[1], index: 2, kind: input, shape index: {}]   ;;  %s872_s3 = inlined_call_operand.hbm [shape: f32[8,128], index: 3, kind: output, shape index: {}]  }
   0x1   :  { %10 = vsyncpa [#allocation7], 0 }
   0x2   :  { %11 = vsyncpa [#allocation5], 0  ;;  %s615_s12 = smov [#allocation3]   ;;  %s616_s14 = smov [#allocation6]  }
   0x3   :  { %s18_s13 = sshll.u32 %s615_s12, 4  ;;  %s27_s15 = sshll.u32 %s616_s14, 4  ;;  %s19_s13 = int_to_ptr.vmem [resolvable:$true] %s18_s13  ;;  %s643_s15 = int_to_ptr.vmem [resolvable:$true] %s27_s15 }
   0x4   :  { %s543_s18 = scalar_lea.hbm %s869_s0, 128 }
   0x5   :  { %p544_p0 = scmp.ne.s32.totalorder %s869_s0, %s543_s18  ;;  %p547_p1 = scmp.lt.u32.totalorder %s543_s18, %s869_s0 }
   0x7   :  { %p549_p2 = pnand %p547_p1, %p544_p0 }
   0x9   :  { %552 = shalt.err (!%p549_p2)
}
   0xa   :  { %s553_s23 = scalar_lea.vmem %s19_s13, 128  ;;  %p558_p4 = scmp.lt.s32.totalorder %s19_s13, %s19_s13 }
   0xb   :  { %p554_p3 = scmp.ne.s32.totalorder %s19_s13, %s553_s23  ;;  %p559_p5 = scmp.lt.s32.totalorder %s553_s23, %s553_s23 }
   0xd   :  { %p560_p6 = por %p559_p5, %p558_p4 }
   0xf   :  { %p561_p7 = pnand %p560_p6, %p554_p3 }
  0x11   :  { %564 = shalt.err (!%p561_p7)
}
  0x12   :  { %21 = dma.hbm_to_vmem [thread:$0]  %s869_s0, 128, %s19_s13, [#allocation4]  }
  0x13   :  { %s565_s28 = scalar_lea.hbm %s870_s1, 2048 }
  0x14   :  { %p566_p8 = scmp.ne.s32.totalorder %s870_s1, %s565_s28  ;;  %p569_p9 = scmp.lt.u32.totalorder %s565_s28, %s870_s1 }
  0x16   :  { %p571_p10 = pnand %p569_p9, %p566_p8 }
  0x18   :  { %574 = shalt.err (!%p571_p10)
}
  0x19   :  { %s575_s6 = scalar_lea.vmem %s643_s15, 2048  ;;  %p580_p12 = scmp.lt.s32.totalorder %s643_s15, %s643_s15 }
  0x1a   :  { %p576_p11 = scmp.ne.s32.totalorder %s643_s15, %s575_s6  ;;  %p581_p13 = scmp.lt.s32.totalorder %s575_s6, %s575_s6 }
  0x1c   :  { %p582_p0 = por %p581_p13, %p580_p12 }
  0x1e   :  { %p583_p1 = pnand %p582_p0, %p576_p11 }
  0x20   :  { %586 = shalt.err (!%p583_p1)
}
  0x21   :  { %s617_s0 = smov 128   ;;  %s618_s7 = smov 8  }
  0x22   :  { %33 = dma.hbm_to_vmem [thread:$0]  %s870_s1, 2048, %s643_s15, [#allocation7], %s617_s0, %s617_s0, %s618_s7  }
  0x23   :  { %609 = dma.done.wait [#allocation4], 128  }
  0x24   :  { %610 = vsyncadd [#allocation4], 4294967168 }
  0x25   :  { %611 = dma.done.wait [#allocation7], 2048  }
  0x26   :  { %612 = vsyncadd [#allocation7], 4294965248  ;;  %v42_v0 = vld [vmem:[#allocation3] sm:$0xff]  ;;  %v674_v1 = vld [vmem:[#allocation6] sm:$0xff]  ;;  %v619_v50 = vmov 0.0|0.0  }
  0x27   :  { %43 = vadd.xlane.f32.xlu0 %v42_v0  ;;  %v676_v2 = vld [vmem:[#allocation6 + $0x8] sm:$0xff]  ;;  %v84_v3 = vmul.f32 %v674_v1, %v674_v1  ;;  %v682_v5 = vld [vmem:[#allocation6 + $0x18] sm:$0xff]  ;;  %v708_v20 = vld [vmem:[#allocation6 + $0x10] sm:$0xff]  ;;  %437 = vmatprep.subr.bf16.mxu0 %v619_v50 }
  0x28   :  { %v85_v4 = vmul.f32 %v676_v2, %v676_v2  ;;  %v87_v6 = vmul.f32 %v682_v5, %v682_v5  ;;  %v686_v7 = vld [vmem:[#allocation6 + $0x28] sm:$0xff]  ;;  %v690_v9 = vld [vmem:[#allocation6 + $0x38] sm:$0xff]  ;;  %v86_v22 = vmul.f32 %v708_v20, %v708_v20  ;;  %v714_v23 = vld [vmem:[#allocation6 + $0x20] sm:$0xff] }
  0x29   :  { %100 = vadd.xlane.f32.xlu1 %v84_v3  ;;  %v89_v8 = vmul.f32 %v686_v7, %v686_v7  ;;  %v91_v10 = vmul.f32 %v690_v9, %v690_v9  ;;  %v694_v11 = vld [vmem:[#allocation6 + $0x48] sm:$0xff]  ;;  %v698_v13 = vld [vmem:[#allocation6 + $0x58] sm:$0xff]  ;;  %v88_v24 = vmul.f32 %v714_v23, %v714_v23  ;;  %v718_v25 = vld [vmem:[#allocation6 + $0x30] sm:$0xff] }
  0x2a   :  { %v93_v12 = vmul.f32 %v694_v11, %v694_v11  ;;  %v95_v14 = vmul.f32 %v698_v13, %v698_v13  ;;  %v702_v15 = vld [vmem:[#allocation6 + $0x68] sm:$0xff]  ;;  %v90_v26 = vmul.f32 %v718_v25, %v718_v25  ;;  %v722_v27 = vld [vmem:[#allocation6 + $0x40] sm:$0xff]  ;;  %v726_v29 = vld [vmem:[#allocation6 + $0x78] sm:$0xff] }
  0x2b   :  { %v97_v16 = vmul.f32 %v702_v15, %v702_v15  ;;  %v92_v28 = vmul.f32 %v722_v27, %v722_v27  ;;  %v728_v30 = vld [vmem:[#allocation6 + $0x50] sm:$0xff]  ;;  %v99_v31 = vmul.f32 %v726_v29, %v726_v29  ;;  %v734_v33 = vld [vmem:[#allocation6 + $0x60] sm:$0xff] }
  0x2c   :  { %v94_v32 = vmul.f32 %v728_v30, %v728_v30  ;;  %v96_v34 = vmul.f32 %v734_v33, %v734_v33  ;;  %v738_v35 = vld [vmem:[#allocation6 + $0x70] sm:$0xff] }
  0x2d   :  { %102 = vadd.xlane.f32.xlu1 %v85_v4  ;;  %v98_v36 = vmul.f32 %v738_v35, %v738_v35 }
  0x31   :  { %106 = vadd.xlane.f32.xlu1 %v87_v6 }
  0x35   :  { %110 = vadd.xlane.f32.xlu1 %v89_v8 }
  0x39   :  { %114 = vadd.xlane.f32.xlu1 %v91_v10 }
  0x3d   :  { %118 = vadd.xlane.f32.xlu1 %v93_v12 }
  0x41   :  { %122 = vadd.xlane.f32.xlu1 %v95_v14 }
  0x45   :  { %126 = vadd.xlane.f32.xlu1 %v97_v16 }
  0x49   :  { %130 = vadd.xlane.f32.xlu1 %v99_v31 }
  0xb4   :  { %v44_v17 = vpop.xlane.xlu0 %43 }
  0xb5   :  { %v46_v18 = vmul.f32 0.0078125, %v44_v17 }
  0xb6   :  { %v101_v37 = vpop.xlane.xlu1 %100 }
  0xb7   :  { %v706_v19 = vsub.f32 %v42_v0, %v46_v18  ;;  %471 = vrsqrt.f32 %v101_v37  ;;  %vm134_vm0 = vcmp.eq.f32.partialorder %v101_v37, inf  ;;  %v137_v42 = vand.u32 2147483648, %v101_v37 }
  0xb8   :  { %vm136_vm2 = vcmp.eq.f32.partialorder %v101_v37, 0.0 }
  0xb9   :  { %v48_v21 = vmul.f32 %v706_v19, %v706_v19 }
  0xba   :  { %v103_v38 = vpop.xlane.xlu1 %102 }
  0xbb   :  { %49 = vadd.xlane.f32.xlu0 %v48_v21  ;;  %473 = vrsqrt.f32 %v103_v38  ;;  %vm141_vm1 = vcmp.eq.f32.partialorder %v103_v38, inf  ;;  %v144_v45 = vand.u32 2147483648, %v103_v38  ;;  %vm143_vm3 = vcmp.eq.f32.partialorder %v103_v38, 0.0 }
  0xbe   :  { %v107_v57 = vpop.xlane.xlu1 %106 }
  0xbf   :  { %104 = vadd.xlane.f32.xlu0 %v86_v22  ;;  %vm155_vm4 = vcmp.eq.f32.partialorder %v107_v57, inf  ;;  %vm157_vm6 = vcmp.eq.f32.partialorder %v107_v57, 0.0  ;;  %v158_v14 = vand.u32 2147483648, %v107_v57 }
  0xc1   :  { %v472_v39 = vpop.eup %471 }
  0xc2   :  { %v133_v40 = vmul.f32 %v472_v39, %v101_v37  ;;  %v111_v58 = vpop.xlane.xlu1 %110 }
  0xc3   :  { %108 = vadd.xlane.f32.xlu0 %v88_v24  ;;  %vm169_vm5 = vcmp.eq.f32.partialorder %v111_v58, inf  ;;  %v172_v17 = vand.u32 2147483648, %v111_v58  ;;  %vm171_vm7 = vcmp.eq.f32.partialorder %v111_v58, 0.0 }
  0xc4   :  { %v135_v44 = vsel %vm134_vm0, %v101_v37, %v133_v40 }
  0xc5   :  { %v474_v41 = vpop.eup %473  ;;  %v138_v47 = vsel %vm136_vm2, %v137_v42, %v135_v44 }
  0xc6   :  { %v140_v43 = vmul.f32 %v474_v41, %v103_v38  ;;  %v244_v49 = vmax.f32 %v138_v47, 1e-12  ;;  %v115_v59 = vpop.xlane.xlu1 %114 }
  0xc7   :  { %112 = vadd.xlane.f32.xlu0 %v90_v26  ;;  %vm183_vm8 = vcmp.eq.f32.partialorder %v115_v59, inf  ;;  %vm185_vm10 = vcmp.eq.f32.partialorder %v115_v59, 0.0 }
  0xc8   :  { %v142_v46 = vsel %vm141_vm1, %v103_v38, %v140_v43  ;;  %475 = vrcp.f32 %v244_v49 }
  0xc9   :  { %v145_v48 = vsel %vm143_vm3, %v144_v45, %v142_v46 }
  0xca   :  { %v245_v51 = vmax.f32 %v145_v48, 1e-12  ;;  %v119_v60 = vpop.xlane.xlu1 %118 }
  0xcb   :  { %116 = vadd.xlane.f32.xlu0 %v92_v28  ;;  %v186_v28 = vand.u32 2147483648, %v115_v59  ;;  %vm197_vm9 = vcmp.eq.f32.partialorder %v119_v60, inf  ;;  %vm199_vm11 = vcmp.eq.f32.partialorder %v119_v60, 0.0 }
  0xcc   :  { %477 = vrcp.f32 %v245_v51 }
  0xcd   :  { %479 = vrsqrt.f32 %v107_v57 }
  0xce   :  { %481 = vrsqrt.f32 %v111_v58  ;;  %v746_v61 = vpop.xlane.xlu1 %122 }
  0xcf   :  { %120 = vadd.xlane.f32.xlu0 %v94_v32  ;;  %483 = vrsqrt.f32 %v115_v59  ;;  %vm211_vm12 = vcmp.eq.f32.partialorder %v746_v61, inf  ;;  %vm213_vm13 = vcmp.eq.f32.partialorder %v746_v61, 0.0 }
  0xd0   :  { %485 = vrsqrt.f32 %v119_v60 }
  0xd1   :  { %487 = vrsqrt.f32 %v746_v61 }
  0xd2   :  { %v476_v52 = vpop.eup %475  ;;  %v751_v10 = vpop.xlane.xlu1 %126 }
  0xd3   :  { %124 = vadd.xlane.f32.xlu0 %v96_v34  ;;  %v261_v54 = vmul.f32 %v476_v52, %v674_v1  ;;  %vm225_vm2 = vcmp.eq.f32.partialorder %v751_v10, inf }
  0xd6   :  { %v478_v53 = vpop.eup %477  ;;  %v763_v43 = vpop.xlane.xlu1 %130 }
  0xd7   :  { %128 = vadd.xlane.f32.xlu0 %v98_v36  ;;  %v263_v55 = vmul.f32 %v478_v53, %v676_v2  ;;  %v480_v63 = vpop.eup %479  ;;  %v200_v36 = vand.u32 2147483648, %v119_v60 }
  0xd8   :  { %v482_v1 = vpop.eup %481  ;;  %v154_v2 = vmul.f32 %v480_v63, %v107_v57  ;;  %v214_v63 = vand.u32 2147483648, %v746_v61 }
  0xd9   :  { %v438_v56 = vpack.c.bf16 %v263_v55, %v261_v54  ;;  %v484_v6 = vpop.eup %483  ;;  %v168_v8 = vmul.f32 %v482_v1, %v111_v58 }
  0xda   :  { %v486_v12 = vpop.eup %485  ;;  %v156_v16 = vsel %vm155_vm4, %v107_v57, %v154_v2  ;;  %v182_v21 = vmul.f32 %v484_v6, %v115_v59 }
  0xdb   :  { %439 = vmatpush3.bf16.msra.mxu0 %v438_v56  ;;  %v170_v22 = vsel %vm169_vm5, %v111_v58, %v168_v8  ;;  %v196_v24 = vmul.f32 %v486_v12, %v119_v60  ;;  %v159_v26 = vsel %vm157_vm6, %v158_v14, %v156_v16  ;;  %v488_v37 = vpop.eup %487  ;;  %vm227_vm5 = vcmp.eq.f32.partialorder %v751_v10, 0.0 }
  0xdc   :  { %440 = vmatprep.subr.bf16.mxu0 %v619_v50  ;;  %v173_v31 = vsel %vm171_vm7, %v172_v17, %v170_v22  ;;  %v184_v32 = vsel %vm183_vm8, %v115_v59, %v182_v21  ;;  %v247_v38 = vmax.f32 %v159_v26, 1e-12  ;;  %v210_v53 = vmul.f32 %v488_v37, %v746_v61 }
  0xdd   :  { %v198_v39 = vsel %vm197_vm9, %v119_v60, %v196_v24  ;;  %v249_v41 = vmax.f32 %v173_v31, 1e-12  ;;  %v187_v42 = vsel %vm185_vm10, %v186_v28, %v184_v32  ;;  %v228_v16 = vand.u32 2147483648, %v751_v10 }
  0xde   :  { %v201_v49 = vsel %vm199_vm11, %v200_v36, %v198_v39  ;;  %v251_v52 = vmax.f32 %v187_v42, 1e-12  ;;  %v212_v1 = vsel %vm211_vm12, %v746_v61, %v210_v53  ;;  %vm239_vm8 = vcmp.eq.f32.partialorder %v763_v43, inf }
  0xdf   :  { %v253_v59 = vmax.f32 %v201_v49, 1e-12  ;;  %v215_v21 = vsel %vm213_vm13, %v214_v63, %v212_v1  ;;  %vm241_vm9 = vcmp.eq.f32.partialorder %v763_v43, 0.0 }
 0x148   :  { %v50_v62 = vpop.xlane.xlu0 %49 }
 0x149   :  { %v51_v0 = vmul.f32 0.0078125, %v50_v62 }
 0x14b   :  { %v52_v3 = vadd.f32 1e-05, %v51_v0 }
 0x14c   :  { %v748_v4 = vpop.xlane.xlu0 %104 }
 0x14d   :  { %489 = vrsqrt.f32 %v52_v3  ;;  %vm148_vm14 = vcmp.eq.f32.partialorder %v748_v4, inf  ;;  %v151_v46 = vand.u32 2147483648, %v748_v4  ;;  %vm150_vm15 = vcmp.eq.f32.partialorder %v748_v4, 0.0 }
 0x14e   :  { %491 = vrsqrt.f32 %v748_v4 }
 0x14f   :  { %493 = vrsqrt.f32 %v751_v10 }
 0x150   :  { %v754_v18 = vpop.xlane.xlu0 %108 }
 0x151   :  { %495 = vrsqrt.f32 %v754_v18  ;;  %vm162_vm0 = vcmp.eq.f32.partialorder %v754_v18, inf  ;;  %v165_v56 = vand.u32 2147483648, %v754_v18  ;;  %vm164_vm1 = vcmp.eq.f32.partialorder %v754_v18, 0.0 }
 0x154   :  { %v758_v34 = vpop.xlane.xlu0 %112 }
 0x155   :  { %497 = vrsqrt.f32 %v758_v34  ;;  %vm176_vm3 = vcmp.eq.f32.partialorder %v758_v34, inf  ;;  %v179_v6 = vand.u32 2147483648, %v758_v34  ;;  %vm178_vm4 = vcmp.eq.f32.partialorder %v758_v34, 0.0 }
 0x156   :  { %499 = vrsqrt.f32 %v763_v43 }
 0x157   :  { %v490_v40 = vpop.eup %489 }
 0x158   :  { %v492_v44 = vpop.eup %491  ;;  %v766_v45 = vmul.f32 %v490_v40, %v706_v19  ;;  %v770_v47 = vpop.xlane.xlu0 %116 }
 0x159   :  { %v147_v48 = vmul.f32 %v492_v44, %v748_v4  ;;  %501 = vrsqrt.f32 %v770_v47  ;;  %v494_v51 = vpop.eup %493  ;;  %vm190_vm6 = vcmp.eq.f32.partialorder %v770_v47, inf  ;;  %v193_v28 = vand.u32 2147483648, %v770_v47 }
 0x15a   :  { %v55_v19 = vmul.f32 %v766_v45, %v766_v45  ;;  %503 = vrcp.f32 %v247_v38  ;;  %v224_v3 = vmul.f32 %v494_v51, %v751_v10  ;;  %vm192_vm7 = vcmp.eq.f32.partialorder %v770_v47, 0.0 }
 0x15b   :  { %v496_v54 = vpop.eup %495  ;;  %v149_v55 = vsel %vm148_vm14, %v748_v4, %v147_v48  ;;  %505 = vrcp.f32 %v249_v41  ;;  %v255_v38 = vmax.f32 %v215_v21, 1e-12  ;;  %v242_v41 = vand.u32 2147483648, %v763_v43 }
 0x15c   :  { %56 = vadd.xlane.f32.xlu0 %v55_v19  ;;  %v152_v57 = vsel %vm150_vm15, %v151_v46, %v149_v55  ;;  %v161_v58 = vmul.f32 %v496_v54, %v754_v18  ;;  %v784_v60 = vpop.xlane.xlu0 %120  ;;  %v226_v22 = vsel %vm225_vm2, %v751_v10, %v224_v3 }
 0x15d   :  { %v246_v62 = vmax.f32 %v152_v57, 1e-12  ;;  %507 = vrsqrt.f32 %v784_v60  ;;  %v229_v39 = vsel %vm227_vm5, %v228_v16, %v226_v22  ;;  %vm204_vm10 = vcmp.eq.f32.partialorder %v784_v60, inf }
 0x15e   :  { %v163_v0 = vsel %vm162_vm0, %v754_v18, %v161_v58  ;;  %509 = vrcp.f32 %v251_v52  ;;  %v207_v46 = vand.u32 2147483648, %v784_v60  ;;  %vm206_vm11 = vcmp.eq.f32.partialorder %v784_v60, 0.0 }
 0x15f   :  { %v498_v2 = vpop.eup %497  ;;  %511 = vrcp.f32 %v246_v62  ;;  %v166_v4 = vsel %vm164_vm1, %v165_v56, %v163_v0  ;;  %v257_v52 = vmax.f32 %v229_v39, 1e-12  ;;  %vm620_vm0 = vmmov 0  }
 0x160   :  { %v248_v8 = vmax.f32 %v166_v4, 1e-12  ;;  %v175_v12 = vmul.f32 %v498_v2, %v758_v34  ;;  %513 = vrcp.f32 %v253_v59  ;;  %v798_v14 = vpop.xlane.xlu0 %124  ;;  %v500_v17 = vpop.eup %499 }
 0x161   :  { %515 = vrsqrt.f32 %v798_v14  ;;  %v238_v31 = vmul.f32 %v500_v17, %v763_v43  ;;  %vm218_vm12 = vcmp.eq.f32.partialorder %v798_v14, inf  ;;  %v221_v59 = vand.u32 2147483648, %v798_v14 }
 0x162   :  { %517 = vrcp.f32 %v248_v8  ;;  %v177_v18 = vsel %vm176_vm3, %v758_v34, %v175_v12  ;;  %vm220_vm13 = vcmp.eq.f32.partialorder %v798_v14, 0.0 }
 0x163   :  { %v502_v24 = vpop.eup %501  ;;  %v180_v26 = vsel %vm178_vm4, %v179_v6, %v177_v18  ;;  %v240_v48 = vsel %vm239_vm8, %v763_v43, %v238_v31 }
 0x164   :  { %v504_v32 = vpop.eup %503  ;;  %v250_v36 = vmax.f32 %v180_v26, 1e-12  ;;  %v189_v37 = vmul.f32 %v502_v24, %v770_v47  ;;  %v129_v61 = vpop.xlane.xlu0 %128  ;;  %v243_v55 = vsel %vm241_vm9, %v242_v41, %v240_v48 }
 0x165   :  { %v506_v34 = vpop.eup %505  ;;  %519 = vrsqrt.f32 %v129_v61  ;;  %v259_v43 = vmax.f32 %v243_v55, 1e-12  ;;  %vm232_vm14 = vcmp.eq.f32.partialorder %v129_v61, inf  ;;  %vm234_vm15 = vcmp.eq.f32.partialorder %v129_v61, 0.0 }
 0x166   :  { %521 = vrcp.f32 %v250_v36  ;;  %v191_v40 = vsel %vm190_vm6, %v770_v47, %v189_v37  ;;  %v267_v47 = vmul.f32 %v504_v32, %v682_v5  ;;  %v271_v5 = vmul.f32 %v506_v34, %v686_v7 }
 0x167   :  { %v508_v42 = vpop.eup %507  ;;  %v194_v44 = vsel %vm192_vm7, %v193_v28, %v191_v40  ;;  %523 = vrcp.f32 %v255_v38  ;;  %v235_v7 = vand.u32 2147483648, %v129_v61 }
 0x168   :  { %v510_v49 = vpop.eup %509  ;;  %v252_v51 = vmax.f32 %v194_v44, 1e-12  ;;  %v203_v10 = vmul.f32 %v508_v42, %v784_v60 }
 0x169   :  { %v512_v19 = vpop.eup %511  ;;  %v275_v3 = vmul.f32 %v510_v49, %v690_v9 }
 0x16a   :  { %v514_v53 = vpop.eup %513  ;;  %525 = vrcp.f32 %v252_v51  ;;  %v205_v54 = vsel %vm204_vm10, %v784_v60, %v203_v10  ;;  %v265_v56 = vmul.f32 %v512_v19, %v708_v20 }
 0x16b   :  { %v516_v57 = vpop.eup %515  ;;  %v208_v58 = vsel %vm206_vm11, %v207_v46, %v205_v54  ;;  %527 = vrcp.f32 %v257_v52  ;;  %v279_v21 = vmul.f32 %v514_v53, %v694_v11 }
 0x16c   :  { %v518_v62 = vpop.eup %517  ;;  %v254_v63 = vmax.f32 %v208_v58, 1e-12  ;;  %v217_v0 = vmul.f32 %v516_v57, %v798_v14  ;;  %v441_v60 = vpack.c.bf16 %v267_v47, %v265_v56 }
 0x16d   :  { %v269_v1 = vmul.f32 %v518_v62, %v714_v23 }
 0x16e   :  { %529 = vrcp.f32 %v254_v63  ;;  %v219_v20 = vsel %vm218_vm12, %v798_v14, %v217_v0  ;;  %442 = vmatpush3.bf16.msra.mxu0 %v441_v60 }
 0x16f   :  { %v520_v2 = vpop.eup %519  ;;  %v222_v4 = vsel %vm220_vm13, %v221_v59, %v219_v20  ;;  %443 = vmatprep.subr.bf16.mxu0 %v619_v50  ;;  %v444_v6 = vpack.c.bf16 %v271_v5, %v269_v1  ;;  %531 = vrcp.f32 %v259_v43 }
 0x170   :  { %v522_v8 = vpop.eup %521  ;;  %v256_v12 = vmax.f32 %v222_v4, 1e-12  ;;  %v231_v16 = vmul.f32 %v520_v2, %v129_v61 }
 0x171   :  { %v273_v23 = vmul.f32 %v522_v8, %v718_v25  ;;  %v524_v14 = vpop.eup %523 }
 0x172   :  { %533 = vrcp.f32 %v256_v12  ;;  %v233_v17 = vsel %vm232_vm14, %v129_v61, %v231_v16  ;;  %445 = vmatpush3.bf16.msra.mxu0 %v444_v6  ;;  %v283_v31 = vmul.f32 %v524_v14, %v698_v13 }
 0x173   :  { %v236_v18 = vsel %vm234_vm15, %v235_v7, %v233_v17  ;;  %446 = vmatprep.subr.bf16.mxu0 %v619_v50  ;;  %v447_v9 = vpack.c.bf16 %v275_v3, %v273_v23 }
 0x174   :  { %v526_v22 = vpop.eup %525  ;;  %v258_v24 = vmax.f32 %v236_v18, 1e-12 }
 0x175   :  { %v277_v26 = vmul.f32 %v526_v22, %v722_v27  ;;  %v528_v28 = vpop.eup %527  ;;  %v621_v27 = vmov 0.0  }
 0x176   :  { %535 = vrcp.f32 %v258_v24  ;;  %448 = vmatpush3.bf16.msra.mxu0 %v447_v9  ;;  %v287_v61 = vmul.f32 %v528_v28, %v702_v15  ;;  %434 = vmatprep.mubr.msk.f32.mxu0 %vm620_vm0, %v621_v27  ;;  %v363_v15 = vstv %s871_s2  ;;  %s622_s2 = smov [#allocation8]  }
 0x177   :  { %449 = vmatprep.subr.bf16.mxu0 %v619_v50  ;;  %v450_v25 = vpack.c.bf16 %v279_v21, %v277_v26  ;;  %537 = vrcp.f32 %v363_v15  ;;  %s375_s12 = sshll.u32 %s622_s2, 4  ;;  %s376_s12 = int_to_ptr.vmem [resolvable:$true] %s375_s12 }
 0x178   :  { %v530_v32 = vpop.eup %529  ;;  %s587_s13 = scalar_lea.vmem %s376_s12, 128  ;;  %p592_p3 = scmp.lt.s32.totalorder %s376_s12, %s376_s12 }
 0x179   :  { %v281_v36 = vmul.f32 %v530_v32, %v728_v30  ;;  %v532_v37 = vpop.eup %531  ;;  %p588_p2 = scmp.ne.s32.totalorder %s376_s12, %s587_s13  ;;  %p593_p4 = scmp.lt.s32.totalorder %s587_s13, %s587_s13 }
 0x17a   :  { %451 = vmatpush3.bf16.msra.mxu0 %v450_v25  ;;  %v291_v39 = vmul.f32 %v532_v37, %v726_v29 }
 0x17b   :  { %452 = vmatprep.subr.bf16.mxu0 %v619_v50  ;;  %v453_v11 = vpack.c.bf16 %v283_v31, %v281_v36  ;;  %p594_p5 = por %p593_p4, %p592_p3 }
 0x17c   :  { %v534_v34 = vpop.eup %533 }
 0x17d   :  { %v285_v38 = vmul.f32 %v534_v34, %v734_v33  ;;  %p595_p6 = pnand %p594_p5, %p588_p2 }
 0x17e   :  { %454 = vmatpush3.bf16.msra.mxu0 %v453_v11 }
 0x17f   :  { %455 = vmatprep.subr.bf16.mxu0 %v619_v50  ;;  %v456_v13 = vpack.c.bf16 %v287_v61, %v285_v38 }
 0x180   :  { %v536_v30 = vpop.eup %535 }
 0x181   :  { %v289_v40 = vmul.f32 %v536_v30, %v738_v35  ;;  %v538_v33 = vpop.eup %537 }
 0x182   :  { %457 = vmatpush3.bf16.msra.mxu0 %v456_v13  ;;  %461 = vpush %v538_v33 }
 0x183   :  { %458 = vmatprep.subr.bf16.mxu0 %v619_v50  ;;  %v459_v41 = vpack.c.bf16 %v291_v39, %v289_v40 }
 0x186   :  { %460 = vmatpush3.bf16.msra.mxu0 %v459_v41 }
 0x1b3   :  { %s462_s11 = spop %461 }
 0x1b4   :  { %v366_v10 = vstv %s462_s11 }
 0x1e9   :  { %v57_v42 = vpop.xlane.xlu0 %56 }
 0x1ea   :  { %539 = vrsqrt.f32 %v57_v42  ;;  %vm60_vm1 = vcmp.eq.f32.partialorder %v57_v42, inf  ;;  %v63_v29 = vand.u32 2147483648, %v57_v42  ;;  %vm62_vm2 = vcmp.eq.f32.partialorder %v57_v42, 0.0 }
 0x1f4   :  { %v540_v44 = vpop.eup %539 }
 0x1f5   :  { %v59_v46 = vmul.f32 %v540_v44, %v57_v42 }
 0x1f7   :  { %v61_v48 = vsel %vm60_vm1, %v57_v42, %v59_v46 }
 0x1f8   :  { %v64_v35 = vsel %vm62_vm2, %v63_v29, %v61_v48 }
 0x1f9   :  { %v65_v49 = vmax.f32 %v64_v35, 1e-12 }
 0x1fb   :  { %541 = vrcp.f32 %v65_v49 }
 0x205   :  { %v542_v50 = vpop.eup %541 }
 0x206   :  { %v67_v51 = vmul.f32 %v542_v50, %v766_v45 }
 0x208   :  { %435 = vmatmul.mubr.f32.vlgmr.msra.gmra.mrb[0].mxu0 %v67_v51 }
 0x2db   :  { %v358_v47 = vpop.f32.mrb[0].mxu0 }
 0x2dc   :  { %v367_v19 = vmul.f32 %v366_v10, %v358_v47  ;;  %v436_v52 = vpop.f32.mrb[1].mxu0 }
 0x2de   :  { %368 = vst [vmem:[#allocation8] sm:$0xff] %v367_v19 }
 0x2df   :  { %598 = shalt.err (!%p595_p6)
}
 0x2e0   :  { %s599_s16 = scalar_lea.hbm %s872_s3, 128 }
 0x2e1   :  { %p600_p7 = scmp.ne.s32.totalorder %s872_s3, %s599_s16  ;;  %p603_p8 = scmp.lt.u32.totalorder %s599_s16, %s872_s3 }
 0x2e3   :  { %p605_p9 = pnand %p603_p8, %p600_p7 }
 0x2e5   :  { %608 = shalt.err (!%p605_p9)
}
 0x2e6   :  { %378 = dma.vmem_to_hbm [thread:$0]  %s376_s12, 128, %s872_s3, [#allocation5]  }
 0x2e7   :  { %613 = dma.done.wait [#allocation5], 128  }
 0x2e8   :  { %614 = vsyncadd [#allocation5], 4294967168 }
 0x2e9   :  { %382 = vsyncpa [#allocation4], 1 }
 0x2ea   :  { %383 = vsyncpa [#allocation7], 1 }
 0x2eb   :  { %384 = vsyncpa [#allocation5], 1 }

</bundles_post_ra>
